<compile_context>
chip_gen: v7x
topology: tpu7x:2x2x1
jax: 0.10.0
libtpu: 0.0.40
codegen_flags: <defaults>
</compile_context>

<pallas_src>
import functools

import jax
import jax.numpy as jnp
from jax import lax
from jax.experimental import pallas as pl
from jax.experimental.pallas import tpu as pltpu

LN_EPS = 1e-5


def _ln_feat(x):
    """LayerNorm over the feature (sublane) axis, no affine (folded into W).

    x: (F, T) float32.  Single-pass variance; `jnp.maximum` guards rounding.
    """
    inv_n = 1.0 / x.shape[0]
    mean = jnp.sum(x, axis=0, keepdims=True) * inv_n
    ex2 = jnp.sum(x * x, axis=0, keepdims=True) * inv_n
    var = jnp.maximum(ex2 - mean * mean, 0.0)
    return (x - mean) * lax.rsqrt(var + LN_EPS)


def _adapter_kernel(gbc, x_ref, w1_ref, b1_ref, w2_ref, b2_ref, o_ref):
    # Loop-invariant params, loaded once per grid step (constant-indexed blocks
    # so Pallas does not re-DMA them across steps).
    w1 = w1_ref[...]                       # (F_out, F_in), LN1 affine folded in
    b1 = b1_ref[...]                       # (F_out, 1) f32
    w2 = w2_ref[...]                       # (F_out, F_out), LN2 affine folded in
    b2 = b2_ref[...]                       # (F_out, 1) f32

    def body(g, carry):
        x = x_ref[g].astype(jnp.float32)                     # (F_in, tS)
        h = _ln_feat(x)                                      # LN(in_features)
        h = jnp.dot(w1, h.astype(w1.dtype),
                    preferred_element_type=jnp.float32) + b1  # Linear1
        h = _ln_feat(h)                                      # LN(out_features)
        y = jnp.dot(w2, h.astype(w2.dtype),
                    preferred_element_type=jnp.float32) + b2  # Linear2
        o_ref[g] = y.astype(o_ref.dtype)                     # lane-dense store
        return carry

    lax.fori_loop(0, gbc, body, 0)


def _largest_divisor_leq(n, cap):
    cap = max(1, min(n, cap))
    for d in range(cap, 0, -1):
        if n % d == 0:
            return d
    return 1


def _choose_tiles(G, S, F_in, F_out, itemsize):
    # Spatial tile: full S when small (always a legal block); only tile when S
    # is large, and then in lane-dense multiples of 128.
    if S <= 2048 or S % 128 != 0:
        ts = S
    else:
        ts = max(t for t in range(128, 2048 + 1, 128) if S % t == 0)

    # (b, c)-slab count per step: grow until the double-buffered (in + out)
    # block reaches ~4 MiB (amortizes the ~0.35 us/step overhead, keeps well
    # under the scoped VMEM limit on every generation, incl. v7x's 64 MiB/TC).
    per_slab = 2 * ts * (F_in + F_out) * itemsize
    target_bytes = 4 << 20
    gbc = _largest_divisor_leq(G, max(1, target_bytes // max(per_slab, 1)))

    # Megacore guard: keep >= 4 total grid steps so v7x's two TensorCores each
    # get >= 2 steps (enough to double-buffer their own DMA).
    while gbc > 1 and (G // gbc) * (S // ts) < 4:
        gbc = _largest_divisor_leq(G, gbc - 1)
    return gbc, ts


@jax.jit
def adapter_forward(x, params):
    """x: (B, C, in_features, S) -> (B, C, out_features, S)."""
    g1, b1, w1, bb1, g2, b2, w2, bb2 = params
    B, C, F_in, S = x.shape
    F_out = w1.shape[0]
    G = B * C

    # Fold the LN affine into the following Linear (exact, tiny precompute):
    #   W @ (xn * g + b) + bb == (W * g^T) @ xn + (W @ b + bb)
    f32 = jnp.float32
    w1f, w2f = w1.astype(f32), w2.astype(f32)
    W1 = (w1f * g1.astype(f32)[:, 0][None, :]).astype(w1.dtype)   # (F_out, F_in)
    B1 = w1f @ b1.astype(f32) + bb1.astype(f32)                   # (F_out, 1) f32
    W2 = (w2f * g2.astype(f32)[:, 0][None, :]).astype(w2.dtype)   # (F_out, F_out)
    B2 = w2f @ b2.astype(f32) + bb2.astype(f32)                   # (F_out, 1) f32

    # Free reshape (no transpose): features on sublanes, S on lanes.
    xr = x.reshape(G, F_in, S)
    itemsize = jnp.dtype(x.dtype).itemsize
    gbc, ts = _choose_tiles(G, S, F_in, F_out, itemsize)

    data = lambda shp: pl.BlockSpec(shp, lambda g, s: (g, 0, s))
    const = lambda shp: pl.BlockSpec(shp, lambda g, s: (0, 0))

    cost = pl.CostEstimate(
        flops=2 * G * S * (F_in * F_out + F_out * F_out),
        transcendentals=2 * G * S,
        bytes_accessed=G * S * (F_in + F_out) * itemsize
        + (F_out * F_in + F_out * F_out) * itemsize + 4 * F_out * 4,
    )

    out = pl.pallas_call(
        functools.partial(_adapter_kernel, gbc),
        out_shape=jax.ShapeDtypeStruct((G, F_out, S), x.dtype),
        grid_spec=pltpu.PrefetchScalarGridSpec(
            num_scalar_prefetch=0,
            grid=(G // gbc, S // ts),
            in_specs=[
                data((gbc, F_in, ts)),     # x slabs
                const((F_out, F_in)),      # W1' (LN1 affine folded)
                const((F_out, 1)),         # b1'
                const((F_out, F_out)),     # W2' (LN2 affine folded)
                const((F_out, 1)),         # b2'
            ],
            out_specs=pl.BlockSpec((gbc, F_out, ts), lambda g, s: (g, 0, s)),
        ),
        compiler_params=pltpu.CompilerParams(
            dimension_semantics=("parallel", "parallel")),
        cost_estimate=cost,
    )(xr, W1, B1, W2, B2)

    return out.reshape(B, C, F_out, S)


def make_params(key, in_features, out_features, dtype=jnp.float32):
    """Deterministic synthetic parameters matching the nn.Sequential shapes.

    Weights are kept in PyTorch (out, in) orientation; per-feature vectors are
    stored as (F, 1) columns so they broadcast along the lane (S) axis.
    """
    k1, k2, k3, k4 = jax.random.split(key, 4)
    g1 = jnp.ones((in_features, 1), dtype)
    b1 = jnp.zeros((in_features, 1), dtype)
    lim1 = 1.0 / (in_features ** 0.5)
    w1 = jax.random.uniform(k1, (out_features, in_features), dtype, -lim1, lim1)
    bb1 = jax.random.uniform(k2, (out_features, 1), dtype, -lim1, lim1)
    g2 = jnp.ones((out_features, 1), dtype)
    b2 = jnp.zeros((out_features, 1), dtype)
    lim2 = 1.0 / (out_features ** 0.5)
    w2 = jax.random.uniform(k3, (out_features, out_features), dtype, -lim2, lim2)
    bb2 = jax.random.uniform(k4, (out_features, 1), dtype, -lim2, lim2)
    return (g1, b1, w1, bb1, g2, b2, w2, bb2)


def adapter_reference(x, params):
    """Pure-JAX reference mirroring the PyTorch forward (no affine fold)."""
    g1, b1, w1, bb1, g2, b2, w2, bb2 = params
    xt = jnp.swapaxes(x, 3, 2).astype(jnp.float32)   # (B, C, S, F_in)

    def ln(v, g, b):
        m = jnp.mean(v, -1, keepdims=True)
        s = jnp.mean(jnp.square(v - m), -1, keepdims=True)
        return (v - m) * lax.rsqrt(s + LN_EPS) * g[:, 0] + b[:, 0]

    h = ln(xt, g1, b1)
    h = h @ w1.astype(jnp.float32).T + bb1[:, 0]
    h = ln(h, g2, b2)
    h = h @ w2.astype(jnp.float32).T + bb2[:, 0]
    return jnp.swapaxes(h, 3, 2).astype(x.dtype)


if __name__ == "__main__":
    B, C, S = 2, 4, 128
    in_features, out_features = 32, 32

    key = jax.random.PRNGKey(0)
    kx, kp = jax.random.split(key)
    x = jax.random.normal(kx, (B, C, in_features, S), jnp.float32)
    params = make_params(kp, in_features, out_features)

    out = adapter_forward(x, params)
    jax.block_until_ready(out)

    ref = adapter_reference(x, params)
    assert out.shape == (B, C, out_features, S)
    assert jnp.allclose(out, ref, atol=1e-4, rtol=1e-4)

    print("KERNEL_OK")
</pallas_src>

<mosaic_0001>
module attributes {stable_mosaic.version = 11 : i64} {
  func.func @_adapter_kernel(%arg0: i32, %arg1: i32, %arg2: memref<2x32x128xf32, #tpu.memory_space<vmem>>, %arg3: memref<32x32xf32, #tpu.memory_space<vmem>>, %arg4: memref<32x1xf32, #tpu.memory_space<vmem>>, %arg5: memref<32x32xf32, #tpu.memory_space<vmem>>, %arg6: memref<32x1xf32, #tpu.memory_space<vmem>>, %arg7: memref<2x32x128xf32, #tpu.memory_space<vmem>>) attributes {dimension_semantics = [#tpu.dimension_semantics<parallel>, #tpu.dimension_semantics<parallel>], iteration_bounds = array<i64: 4, 1>, scalar_prefetch = 0 : i64, scratch_operands = 0 : i64, tpu.core_type = #tpu.core_type<tc>, window_params = [{transform_indices = @transform_0, window_bounds = array<i64: 2, 32, 128>}, {pipeline_mode = #tpu.pipeline_mode<synchronous>, transform_indices = @transform_1, window_bounds = array<i64: 32, 32>}, {pipeline_mode = #tpu.pipeline_mode<synchronous>, transform_indices = @transform_2, window_bounds = array<i64: 32, 1>}, {pipeline_mode = #tpu.pipeline_mode<synchronous>, transform_indices = @transform_3, window_bounds = array<i64: 32, 32>}, {pipeline_mode = #tpu.pipeline_mode<synchronous>, transform_indices = @transform_4, window_bounds = array<i64: 32, 1>}, {transform_indices = @transform_5, window_bounds = array<i64: 2, 32, 128>}]} {
    %c0 = arith.constant 0 : index
    %c0_0 = arith.constant 0 : index
    %0 = vector.load %arg3[%c0, %c0_0] : memref<32x32xf32, #tpu.memory_space<vmem>>, vector<32x32xf32>
    %c0_1 = arith.constant 0 : index
    %c0_2 = arith.constant 0 : index
    %1 = vector.load %arg4[%c0_1, %c0_2] : memref<32x1xf32, #tpu.memory_space<vmem>>, vector<32x1xf32>
    %c0_3 = arith.constant 0 : index
    %c0_4 = arith.constant 0 : index
    %2 = vector.load %arg5[%c0_3, %c0_4] : memref<32x32xf32, #tpu.memory_space<vmem>>, vector<32x32xf32>
    %c0_5 = arith.constant 0 : index
    %c0_6 = arith.constant 0 : index
    %3 = vector.load %arg6[%c0_5, %c0_6] : memref<32x1xf32, #tpu.memory_space<vmem>>, vector<32x1xf32>
    %c0_i32 = arith.constant 0 : i32
    %c2_i32 = arith.constant 2 : i32
    %4 = arith.addi %c0_i32, %c2_i32 : i32
    %c1_i32 = arith.constant 1 : i32
    scf.for %arg8 = %c0_i32 to %4 step %c1_i32  : i32 {
      %5 = arith.index_cast %arg8 : i32 to index
      %c0_8 = arith.constant 0 : index
      %c0_9 = arith.constant 0 : index
      %6 = vector.load %arg2[%5, %c0_8, %c0_9] : memref<2x32x128xf32, #tpu.memory_space<vmem>>, vector<1x32x128xf32>
      %7 = vector.shape_cast %6 : vector<1x32x128xf32> to vector<32x128xf32>
      %cst = arith.constant dense<0.000000e+00> : vector<128xf32>
      %8 = vector.multi_reduction <add>, %7, %cst [0] : vector<32x128xf32> to vector<128xf32>
      %9 = vector.shape_cast %8 : vector<128xf32> to vector<1x128xf32>
      %cst_10 = arith.constant 3.125000e-02 : f32
      %10 = vector.broadcast %cst_10 : f32 to vector<1x128xf32>
      %11 = arith.mulf %9, %10 : vector<1x128xf32>
      %12 = arith.mulf %7, %7 : vector<32x128xf32>
      %cst_11 = arith.constant dense<0.000000e+00> : vector<128xf32>
      %13 = vector.multi_reduction <add>, %12, %cst_11 [0] : vector<32x128xf32> to vector<128xf32>
      %14 = vector.shape_cast %13 : vector<128xf32> to vector<1x128xf32>
      %cst_12 = arith.constant 3.125000e-02 : f32
      %15 = vector.broadcast %cst_12 : f32 to vector<1x128xf32>
      %16 = arith.mulf %14, %15 : vector<1x128xf32>
      %17 = arith.mulf %11, %11 : vector<1x128xf32>
      %18 = arith.subf %16, %17 : vector<1x128xf32>
      %cst_13 = arith.constant 0.000000e+00 : f32
      %19 = vector.broadcast %cst_13 : f32 to vector<1x128xf32>
      %20 = arith.maximumf %18, %19 : vector<1x128xf32>
      %21 = vector.broadcast %11 : vector<1x128xf32> to vector<32x128xf32>
      %22 = arith.subf %7, %21 : vector<32x128xf32>
      %cst_14 = arith.constant 9.99999974E-6 : f32
      %23 = vector.broadcast %cst_14 : f32 to vector<1x128xf32>
      %24 = arith.addf %20, %23 : vector<1x128xf32>
      %25 = math.rsqrt %24 : vector<1x128xf32>
      %26 = vector.broadcast %25 : vector<1x128xf32> to vector<32x128xf32>
      %27 = arith.mulf %22, %26 : vector<32x128xf32>
      %cst_15 = arith.constant dense<0.000000e+00> : vector<32x128xf32>
      %28 = tpu.matmul %0, %27, %cst_15 {dimension_numbers = #tpu.dot_dimension_numbers<[1], [0], [0], [1], [0, 0, 1, 1], [], []>} : vector<32x32xf32>, vector<32x128xf32>, vector<32x128xf32> -> vector<32x128xf32>
      %29 = vector.broadcast %1 : vector<32x1xf32> to vector<32x128xf32>
      %30 = arith.addf %28, %29 : vector<32x128xf32>
      %cst_16 = arith.constant dense<0.000000e+00> : vector<128xf32>
      %31 = vector.multi_reduction <add>, %30, %cst_16 [0] : vector<32x128xf32> to vector<128xf32>
      %32 = vector.shape_cast %31 : vector<128xf32> to vector<1x128xf32>
      %cst_17 = arith.constant 3.125000e-02 : f32
      %33 = vector.broadcast %cst_17 : f32 to vector<1x128xf32>
      %34 = arith.mulf %32, %33 : vector<1x128xf32>
      %35 = arith.mulf %30, %30 : vector<32x128xf32>
      %cst_18 = arith.constant dense<0.000000e+00> : vector<128xf32>
      %36 = vector.multi_reduction <add>, %35, %cst_18 [0] : vector<32x128xf32> to vector<128xf32>
      %37 = vector.shape_cast %36 : vector<128xf32> to vector<1x128xf32>
      %cst_19 = arith.constant 3.125000e-02 : f32
      %38 = vector.broadcast %cst_19 : f32 to vector<1x128xf32>
      %39 = arith.mulf %37, %38 : vector<1x128xf32>
      %40 = arith.mulf %34, %34 : vector<1x128xf32>
      %41 = arith.subf %39, %40 : vector<1x128xf32>
      %cst_20 = arith.constant 0.000000e+00 : f32
      %42 = vector.broadcast %cst_20 : f32 to vector<1x128xf32>
      %43 = arith.maximumf %41, %42 : vector<1x128xf32>
      %44 = vector.broadcast %34 : vector<1x128xf32> to vector<32x128xf32>
      %45 = arith.subf %30, %44 : vector<32x128xf32>
      %cst_21 = arith.constant 9.99999974E-6 : f32
      %46 = vector.broadcast %cst_21 : f32 to vector<1x128xf32>
      %47 = arith.addf %43, %46 : vector<1x128xf32>
      %48 = math.rsqrt %47 : vector<1x128xf32>
      %49 = vector.broadcast %48 : vector<1x128xf32> to vector<32x128xf32>
      %50 = arith.mulf %45, %49 : vector<32x128xf32>
      %cst_22 = arith.constant dense<0.000000e+00> : vector<32x128xf32>
      %51 = tpu.matmul %2, %50, %cst_22 {dimension_numbers = #tpu.dot_dimension_numbers<[1], [0], [0], [1], [0, 0, 1, 1], [], []>} : vector<32x32xf32>, vector<32x128xf32>, vector<32x128xf32> -> vector<32x128xf32>
      %52 = vector.broadcast %3 : vector<32x1xf32> to vector<32x128xf32>
      %53 = arith.addf %51, %52 : vector<32x128xf32>
      %54 = arith.index_cast %arg8 : i32 to index
      %c0_23 = arith.constant 0 : index
      %c0_24 = arith.constant 0 : index
      %55 = vector.load %arg7[%54, %c0_23, %c0_24] : memref<2x32x128xf32, #tpu.memory_space<vmem>>, vector<1x32x128xf32>
      %56 = vector.shape_cast %55 : vector<1x32x128xf32> to vector<32x128xf32>
      %57 = vector.shape_cast %53 : vector<32x128xf32> to vector<1x32x128xf32>
      tpu.vector_store %arg7[%54, %c0_23, %c0_24], %57 {strides = array<i32>} : memref<2x32x128xf32, #tpu.memory_space<vmem>>, vector<1x32x128xf32>,
    }
    %c2_i32_7 = arith.constant 2 : i32
    return
  }
  func.func @transform_0(%arg0: i32, %arg1: i32) -> (i32, i32, i32) {
    %c0_i32 = arith.constant 0 : i32
    %c0_i32_0 = arith.constant 0 : i32
    return %arg0, %c0_i32, %arg1 : i32, i32, i32
  }
  func.func @transform_1(%arg0: i32, %arg1: i32) -> (i32, i32) {
    %c0_i32 = arith.constant 0 : i32
    %c0_i32_0 = arith.constant 0 : i32
    %c0_i32_1 = arith.constant 0 : i32
    return %c0_i32, %c0_i32_0 : i32, i32
  }
  func.func @transform_2(%arg0: i32, %arg1: i32) -> (i32, i32) {
    %c0_i32 = arith.constant 0 : i32
    %c0_i32_0 = arith.constant 0 : i32
    %c0_i32_1 = arith.constant 0 : i32
    return %c0_i32, %c0_i32_0 : i32, i32
  }
  func.func @transform_3(%arg0: i32, %arg1: i32) -> (i32, i32) {
    %c0_i32 = arith.constant 0 : i32
    %c0_i32_0 = arith.constant 0 : i32
    %c0_i32_1 = arith.constant 0 : i32
    return %c0_i32, %c0_i32_0 : i32, i32
  }
  func.func @transform_4(%arg0: i32, %arg1: i32) -> (i32, i32) {
    %c0_i32 = arith.constant 0 : i32
    %c0_i32_0 = arith.constant 0 : i32
    %c0_i32_1 = arith.constant 0 : i32
    return %c0_i32, %c0_i32_0 : i32, i32
  }
  func.func @transform_5(%arg0: i32, %arg1: i32) -> (i32, i32, i32) {
    %c0_i32 = arith.constant 0 : i32
    %c0_i32_0 = arith.constant 0 : i32
    return %arg0, %c0_i32, %arg1 : i32, i32, i32
  }
}

</mosaic_0001>

<bundles_post_ra>
// kernel: adapter_forward.1
= control target key start
LH: loop header
LB: loop body
LE: loop exit
PB: predicated region body
PF: predicated region fallthrough
CT: control target
= control target key end

     0   :  { %10 = vsyncpa [#allocation3], 0  ;;  %s1342_s0 = inlined_call_operand.hbm [shape: f32[8,32,128], index: 0, kind: input, shape index: {}]   ;;  %s1343_s1 = inlined_call_operand.vmem [shape: f32[32,32], index: 1, kind: input, shape index: {}]   ;;  %s1344_s2 = inlined_call_operand.vmem [shape: f32[32,1], index: 2, kind: input, shape index: {}]   ;;  %s1345_s3 = inlined_call_operand.vmem [shape: f32[32,32], index: 3, kind: input, shape index: {}]   ;;  %s1346_s4 = inlined_call_operand.vmem [shape: f32[32,1], index: 4, kind: input, shape index: {}]   ;;  %s1347_s5 = inlined_call_operand.hbm [shape: f32[8,32,128], index: 5, kind: output, shape index: {}]  }
   0x1   :  { %12 = vsyncpa [#allocation3 + $0x1], 0 }
   0x2   :  { %13 = vsyncpa [#allocation4], 0 }
   0x3   :  { %15 = vsyncpa [#allocation4 + $0x1], 0  ;;  %s1045_s18 = smov 0   ;;  %s1047_s19 = smov 0  }
   0x4   :  { %s1049_s20 = smov 0   ;;  %s1051_s21 = smov 0  }
   0x5   :  { %s1053_s22 = smov 0   ;;  %s1055_s23 = smov 0  }
   0x6 LB: > { %s715_s24 = sadd.s32 4294967295, %s1002_s23   ;;  %s716_s25 = sadd.s32 4294967294, %s1002_s23   ;;  %s1002_s23 = sphi %s1055_s23, %s21_s23   ;;  %s998_s22 = sphi %s1053_s22, %s1361_s22   ;;  %s994_s21 = sphi %s1051_s21, %s1360_s21   ;;  %s990_s20 = sphi %s1049_s20, %s1359_s20   ;;  %s986_s19 = sphi %s1047_s19, %s1358_s19   ;;  %s982_s18 = sphi %s1045_s18, %s1357_s18  }
   0x7   : > { %s33_s26 = sadd.s32 1, %s998_s22  ;;  %s42_s27 = sadd.s32 1, %s990_s20 }
   0x8   : > { %p35_p0 = scmp.ge.s32.totalorder %s33_s26, 4  ;;  %p49_p1 = scmp.ne.s32.totalorder %s990_s20, %s986_s19 }
   0x9   : > { %p50_p2 = scmp.eq.s32.totalorder %s1002_s23, 0  ;;  %p55_p3 = scmp.ne.s32.totalorder %s986_s19, %s982_s18 }
   0xa   : > { %s1363_s26 = smov (%p35_p0, %s33_s26), 0  ;;  %p56_p5 = scmp.eq.s32.totalorder %s715_s24, 0 }
   0xb   : > { %p1086_p4 = por %p50_p2, %p49_p1  ;;  %s37_s29 = ssub.s32 %s998_s22, %s1363_s26 }
   0xc   : > { %p165_p6 = scmp.eq.s32.totalorder %s715_s24, 3  ;;  %p40_p7 = scmp.eq.s32.totalorder %s37_s29, 0 }
   0xd   : > { %p1092_p8 = por %p56_p5, %p55_p3  ;;  %p171_p10 = scmp.eq.s32.totalorder %s716_s25, 3 }
   0xe   : > { %p1096_p9 = por %p165_p6, %p49_p1  ;;  %p817_p12 = scmp.lt.s32.totalorder %s1002_s23, 4 }
   0xf   : > { %s1101_s7 = scalar_select %p40_p7, %s990_s20, %s42_s27  }
  0x10   : > { %s1351_s6 = scalar_select %p1096_p9, 1, 0 }
  0x11   : > { %p1103_p11 = por %p171_p10, %p55_p3  ;;  %s203_s9 = sand.u32 1, %s990_s20  }
  0x12   : > { %s719_s10 = sshll.u32 %s203_s9, 6  ;;  %s742_s11 = sshll.u32 %s998_s22, 10 }
  0x13   : > { %s1352_s8 = scalar_select %p1103_p11, 1, 0 }
  0x14   : > { %s1113_s14 = scalar_lea.hbm %s1342_s0, %s742_s11  ;;  %s207_s15 = scalar_lea.vmem [#allocation2], %s719_s10 }
  0x15   : > { %s216_s16 = sshll.u32 %s207_s15, 4  ;;  %p1119_p13 = pnand %p817_p12, %p1086_p4  ;;  %s1115_s16 = int_to_ptr.vmem [resolvable:$true] %s216_s16 }
  0x16   : > { %s1124_s24 = scalar_lea.sflag [#allocation3], %s203_s9  ;;  %s886_s25 = scalar_lea.hbm %s1113_s14, 1024 }
  0x17   : > { %p887_p1 = scmp.ne.s32.totalorder %s1113_s14, %s886_s25  ;;  %p888_p2 = pneg %p1119_p13 }
  0x18   : > { %s891_s28 = scalar_lea.hbm %s1342_s0, 4096  ;;  %p892_p4 = scmp.lt.u32.totalorder %s1113_s14, %s1342_s0 }
  0x19   : > { %p889_p3 = pnand %p888_p2, %p887_p1  ;;  %p893_p6 = scmp.lt.u32.totalorder %s891_s28, %s886_s25 }
  0x1a   : > { %p895_p10 = scmp.lt.u32.totalorder %s886_s25, %s1113_s14 }
  0x1b   : > { %p890_p5 = pneg %p889_p3  ;;  %p894_p7 = por %p893_p6, %p892_p4 }
  0x1d   : > { %p896_p12 = por %p895_p10, %p894_p7 }
  0x1f   : > { %p897_p0 = pnand %p896_p12, %p890_p5 }
  0x21   : > { %900 = shalt.err (!%p897_p0)
}
  0x22   : > { %s901_s9 = scalar_lea.vmem %s1115_s16, 1024  ;;  %s1008_s12 = smov [#allocation2]  }
  0x23   : > { %p902_p1 = scmp.ne.s32.totalorder %s1115_s16, %s901_s9  ;;  %s906_s13 = sshll.u32 %s1008_s12, 4  ;;  %s907_s13 = int_to_ptr.vmem [resolvable:$false] %s906_s13 }
  0x24   : > { %s908_s15 = scalar_lea.vmem %s907_s13, 2048  ;;  %p909_p9 = scmp.lt.s32.totalorder %s1115_s16, %s907_s13 }
  0x25   : > { %p904_p3 = pnand %p902_p1, %p888_p2  ;;  %p910_p4 = scmp.lt.s32.totalorder %s908_s15, %s901_s9 }
  0x27   : > { %p905_p11 = pneg %p904_p3  ;;  %p911_p6 = por %p910_p4, %p909_p9 }
  0x29   : > { %p912_p7 = pnand %p911_p6, %p905_p11 }
  0x2b   : > { %915 = shalt.err (!%p912_p7)
}
  0x2c   : > { %s1009_s25 = smov 128   ;;  %s1010_s27 = smov 8  }
  0x2d   : > { %812 = dma.hbm_to_vmem [thread:$0]  (!%p1119_p13), %s1113_s14, 1024, %s1115_s16, %s1124_s24, %s1009_s25, %s1009_s25, %s1010_s27  }
  0x2e   : > { %p224_p0 = scmp.lt.s32.totalorder %s1002_s23, 5  ;;  %p1354_p2 = scmp.ge.s32.totalorder %s1002_s23, 1 }
  0x30   : > { %p225_p5 = pnand %p1354_p2, %p224_p0 }
  0x31   : > { %s1156_s29 = sand.u32 (!%p225_p5), 1, %s986_s19  }
  0x32   : > { %228 = sbr.rel (%p225_p5) target bundleno = 620 (0x26c), region = 40  ;;  %s724_s28 = sshll.u32 (!%p225_p5), %s1156_s29, 6 }
  0x33   : > { %s231_s10 = scalar_lea.sflag (!%p225_p5), [#allocation3], %s1156_s29  ;;  %s1160_s11 = scalar_lea.vmem (!%p225_p5), [#allocation2], %s724_s28 }
  0x39   : > { %973 = dma.done.wait (%p1092_p8), %s231_s10, 1024  }
  0x3a   : > { %975 = vsyncadd (%p1092_p8), %s231_s10, 4294966272  ;;  %v1169_v0 = vld [vmem:[%s1343_s1] sm:$0xff]  ;;  %v1174_v1 = vld [vmem:[%s1343_s1 + $0x8] sm:$0xff]  ;;  %s1246_s30 = scalar_lea.vmem [#allocation5], %s724_s28  ;;  %s1248_s25 = smov 0  }
  0x3b   : > { %v1179_v2 = vld [vmem:[%s1343_s1 + $0x10] sm:$0xff]  ;;  %v1184_v3 = vld [vmem:[%s1343_s1 + $0x18] sm:$0xff]  ;;  %v1189_v4 = vld [vmem:[%s1344_s2] sm:$0xff] }
  0x3c   : > { %v1194_v5 = vld [vmem:[%s1344_s2 + $0x8] sm:$0xff]  ;;  %v1199_v6 = vld [vmem:[%s1344_s2 + $0x10] sm:$0xff]  ;;  %v1204_v7 = vld [vmem:[%s1344_s2 + $0x18] sm:$0xff] }
  0x3d   : > { %v1209_v8 = vld [vmem:[%s1345_s3] sm:$0xff]  ;;  %v1214_v9 = vld [vmem:[%s1345_s3 + $0x8] sm:$0xff]  ;;  %v1219_v10 = vld [vmem:[%s1345_s3 + $0x10] sm:$0xff] }
  0x3e   : > { %v1224_v11 = vld [vmem:[%s1345_s3 + $0x18] sm:$0xff]  ;;  %v1229_v12 = vld [vmem:[%s1346_s4] sm:$0xff]  ;;  %v1234_v13 = vld [vmem:[%s1346_s4 + $0x8] sm:$0xff] }
  0x3f   : > { %v1239_v14 = vld [vmem:[%s1346_s4 + $0x10] sm:$0xff]  ;;  %v1244_v15 = vld [vmem:[%s1346_s4 + $0x18] sm:$0xff] }
  0x40 LB: >> { %vm348_vm0 = vcmask 261120   ;;  %v1011_v16 = vmov 0   ;;  %s726_s27 = sshll.u32 %s1006_s25, 5  ;;  %s284_s25 = sadd.s32 1, %s1006_s25   ;;  %s1006_s25 = sphi %s1248_s25, %s284_s25  }
  0x41   : >> { %769 = vmatprep.mubr.msk.f32.mxu0 %vm348_vm0, %v1169_v0  ;;  %880 = vset.pattern.permute.xlu0 %v1011_v16  ;;  %s286_s28 = scalar_lea.vmem %s1160_s11, %s726_s27 [#allocation2]  ;;  %s600_s10 = scalar_lea.vmem %s1246_s30, %s726_s27 [#allocation5] }
  0x42   : >> { %330 = vperm.xlu0 %880, %v1189_v4   ;;  %881 = vset.pattern.permute.xlu1 %v1011_v16  ;;  %v287_v17 = vld [vmem:[%s286_s28] sm:$0xff]  ;;  %v288_v18 = vld [vmem:[%s286_s28 + $0x8] sm:$0xff]  ;;  %v289_v19 = vld [vmem:[%s286_s28 + $0x10] sm:$0xff]  ;;  %p281_p8 = scmp.ge.s32.totalorder %s284_s25, 2  }
  0x43   : >> { %340 = vperm.xlu1 %881, %v1199_v6   ;;  %783 = vmatprep.mubr.msk.f32.mxu1 %vm348_vm0, %v1209_v8  ;;  %v290_v20 = vld [vmem:[%s286_s28 + $0x18] sm:$0xff]  ;;  %v291_v21 = vadd.f32 %v288_v18, %v287_v17  ;;  %v301_v22 = vmul.f32 %v287_v17, %v287_v17  ;;  %v302_v23 = vmul.f32 %v288_v18, %v288_v18  ;;  %s744_s14 = sshll.u32 (%p281_p8), %s994_s21, 10  ;;  %s621_s9 = sshll.u32 (%p281_p8), %s1246_s30, 4  ;;  %s1294_s9 = int_to_ptr.vmem [resolvable:$true] %s621_s9 }
  0x44   : >> { %v303_v24 = vmul.f32 %v289_v19, %v289_v19  ;;  %v304_v26 = vmul.f32 %v290_v20, %v290_v20  ;;  %s1291_s24 = scalar_lea.hbm (%p281_p8), %s1347_s5, %s744_s14  ;;  %s606_s12 = scalar_lea.sflag (%p281_p8), [#allocation4], %s1156_s29 }
  0x45   : >> { %v292_v25 = vadd.f32 %v291_v21, %v289_v19  ;;  %v305_v27 = vadd.f32 %v302_v23, %v301_v22  ;;  %s916_s13 = scalar_lea.vmem (%p281_p8), %s1294_s9, 1024  ;;  %p1355_p11 = scmp.ne.s32.totalorder (%p281_p8), %s1351_s6, 0 }
  0x46   : >> { %335 = vperm.xlu0 %880, %v1194_v5   ;;  %p917_p9 = scmp.ne.s32.totalorder (%p281_p8), %s1294_s9, %s916_s13  ;;  %s1012_s11 = smov (%p281_p8), [#allocation5]  }
  0x47   : >> { %345 = vperm.xlu1 %881, %v1204_v7   ;;  %v293_v28 = vadd.f32 %v292_v25, %v290_v20  ;;  %v306_v29 = vadd.f32 %v305_v27, %v303_v24  ;;  %s920_s15 = sshll.u32 (%p281_p8), %s1012_s11, 4  ;;  %s921_s15 = int_to_ptr.vmem [resolvable:$false] %s920_s15 }
  0x48   : > { %p918_p13 = pnand (%p281_p8), %p917_p9, %p1355_p11  ;;  %s922_s21 = scalar_lea.vmem (%p281_p8), %s921_s15, 2048 }
  0x49   : >> { %v294_v30 = vrot.slane %v293_v28, 4  ;;  %v307_v31 = vadd.f32 %v306_v29, %v304_v26  ;;  %p923_p12 = scmp.lt.s32.totalorder (%p281_p8), %s1294_s9, %s921_s15  ;;  %p924_p1 = scmp.lt.s32.totalorder (%p281_p8), %s922_s21, %s916_s13 }
  0x4a   : >> { %485 = vperm.xlu0 %880, %v1229_v12   ;;  %p919_p10 = pneg (%p281_p8), %p918_p13 }
  0x4b   : >> { %490 = vperm.xlu1 %881, %v1234_v13   ;;  %v295_v32 = vadd.f32 %v294_v30, %v293_v28  ;;  %v308_v33 = vrot.slane %v307_v31, 4  ;;  %p925_p3 = por (%p281_p8), %p924_p1, %p923_p12 }
  0x4d   : >> { %v296_v34 = vrot.slane %v295_v32, 2  ;;  %v309_v35 = vadd.f32 %v308_v33, %v307_v31  ;;  %p926_p4 = pnand (%p281_p8), %p925_p3, %p919_p10 }
  0x4e   : >> { %495 = vperm.xlu0 %880, %v1239_v14  }
  0x4f   : >> { %500 = vperm.xlu1 %881, %v1244_v15   ;;  %v297_v36 = vadd.f32 %v296_v34, %v295_v32  ;;  %v310_v37 = vrot.slane %v309_v35, 2 }
  0x51   : >> { %v298_v38 = vrot.slane %v297_v36, 1  ;;  %v311_v39 = vadd.f32 %v310_v37, %v309_v35 }
  0x53   : >> { %v299_v40 = vadd.f32 %v298_v38, %v297_v36  ;;  %v312_v41 = vrot.slane %v311_v39, 1 }
  0x55   : >> { %v300_v42 = vmul.f32 0.03125, %v299_v40  ;;  %v313_v43 = vadd.f32 %v312_v41, %v311_v39 }
  0x57   : >> { %v314_v44 = vmul.f32 0.03125, %v313_v43  ;;  %v315_v45 = vmul.f32 %v300_v42, %v300_v42  ;;  %v318_v49 = vsub.f32 %v287_v17, %v300_v42  ;;  %v319_v50 = vsub.f32 %v288_v18, %v300_v42 }
  0x58   : >> { %v320_v51 = vsub.f32 %v289_v19, %v300_v42  ;;  %v321_v52 = vsub.f32 %v290_v20, %v300_v42 }
  0x59   : >> { %v316_v46 = vsub.f32 %v314_v44, %v315_v45 }
  0x5b   : >> { %v317_v47 = vmax.f32 %v316_v46, 0.0 }
  0x5d   : >> { %v322_v48 = vadd.f32 1e-05, %v317_v47 }
  0x5f   : >> { %882 = vrsqrt.f32 %v322_v48 }
  0x69   : >> { %v883_v53 = vpop.eup %882 }
  0x6a   : >> { %v324_v54 = vmul.f32 %v883_v53, %v318_v49  ;;  %v325_v55 = vmul.f32 %v883_v53, %v319_v50  ;;  %v326_v56 = vmul.f32 %v883_v53, %v320_v51  ;;  %v327_v57 = vmul.f32 %v883_v53, %v321_v52 }
  0x6c   : >> { %v789_v58 = vpack.c.bf16 %v325_v55, %v324_v54  ;;  %v793_v59 = vpack.c.bf16 %v327_v57, %v326_v56 }
  0x6e   : >> { %790 = vmatprep.subr.bf16.mxu0 %v789_v58 }
  0x6f   : >> { %792 = vmatpush3.bf16.msra.mxu0 %v789_v58 }
  0x70   : >> { %794 = vmatprep.subr.bf16.mxu0 %v793_v59 }
  0x73   : >> { %796 = vmatpush3.bf16.msra.mxu0 %v793_v59 }
  0x76   : >> { %770 = vmatmul.mubr.msk.f32.vlgmr.msra.gmra.mrb[0].mxu0 %vm348_vm0, %v1174_v1 }
  0x77   : >> { %772 = vmatprep.mubr.msk.f32.mxu0 %vm348_vm0, %v1179_v2 }
  0x7a   : >> { %773 = vmatmul.mubr.msk.f32.gmra.mrb[2].mxu0 %vm348_vm0, %v1184_v3 }
  0xc1   : >> { %v331_v60 = vpop.permute.xlu0 %330 }
  0xc2   : >> { %v341_v61 = vpop.permute.xlu1 %340 }
  0xc5   : >> { %v336_v62 = vpop.permute.xlu0 %335 }
  0xc6   : >> { %v346_v23 = vpop.permute.xlu1 %345 }
 0x149   : >> { %v771_v63 = vpop.f32.mrb[0].mxu0 }
 0x14a   : >> { %v433_v16 = vadd.f32 %v771_v63, %v336_v62  ;;  %v427_v17 = vpop.f32.mrb[1].mxu0  ;;  %v491_v63 = vpop.permute.xlu1 %490 }
 0x14b   : >> { %v428_v18 = vadd.f32 %v427_v17, %v331_v60 }
 0x14c   : >> { %v457_v19 = vmul.f32 %v433_v16, %v433_v16 }
 0x14d   : >> { %v446_v20 = vadd.f32 %v433_v16, %v428_v18  ;;  %v456_v21 = vmul.f32 %v428_v18, %v428_v18  ;;  %v774_v22 = vpop.f32.mrb[2].mxu0 }
 0x14e   : >> { %v437_v24 = vpop.f32.mrb[3].mxu0  ;;  %v443_v26 = vadd.f32 %v774_v22, %v346_v23 }
 0x14f   : >> { %v460_v25 = vadd.f32 %v457_v19, %v456_v21  ;;  %v438_v27 = vadd.f32 %v437_v24, %v341_v61  ;;  %v501_v21 = vpop.permute.xlu1 %500 }
 0x150   : >> { %v459_v30 = vmul.f32 %v443_v26, %v443_v26 }
 0x151   : >> { %v447_v28 = vadd.f32 %v446_v20, %v438_v27  ;;  %v458_v29 = vmul.f32 %v438_v27, %v438_v27 }
 0x153   : >> { %v448_v31 = vadd.f32 %v447_v28, %v443_v26  ;;  %v461_v32 = vadd.f32 %v460_v25, %v458_v29 }
 0x155   : >> { %v449_v33 = vrot.slane %v448_v31, 4  ;;  %v462_v34 = vadd.f32 %v461_v32, %v459_v30 }
 0x157   : >> { %v450_v35 = vadd.f32 %v449_v33, %v448_v31  ;;  %v463_v36 = vrot.slane %v462_v34, 4 }
 0x159   : >> { %v451_v37 = vrot.slane %v450_v35, 2  ;;  %v464_v38 = vadd.f32 %v463_v36, %v462_v34 }
 0x15b   : >> { %v452_v39 = vadd.f32 %v451_v37, %v450_v35  ;;  %v465_v40 = vrot.slane %v464_v38, 2 }
 0x15d   : >> { %v453_v41 = vrot.slane %v452_v39, 1  ;;  %v466_v42 = vadd.f32 %v465_v40, %v464_v38 }
 0x15f   : >> { %v454_v43 = vadd.f32 %v453_v41, %v452_v39  ;;  %v467_v44 = vrot.slane %v466_v42, 1 }
 0x161   : >> { %v455_v45 = vmul.f32 0.03125, %v454_v43  ;;  %v468_v46 = vadd.f32 %v467_v44, %v466_v42 }
 0x163   : >> { %v469_v47 = vmul.f32 0.03125, %v468_v46  ;;  %v470_v48 = vmul.f32 %v455_v45, %v455_v45  ;;  %v475_v49 = vsub.f32 %v438_v27, %v455_v45  ;;  %v473_v50 = vsub.f32 %v428_v18, %v455_v45 }
 0x164   : >> { %v474_v51 = vsub.f32 %v433_v16, %v455_v45  ;;  %v476_v52 = vsub.f32 %v443_v26, %v455_v45  ;;  %v486_v16 = vpop.permute.xlu0 %485 }
 0x165   : >> { %v471_v53 = vsub.f32 %v469_v47, %v470_v48 }
 0x167   : >> { %v472_v54 = vmax.f32 %v471_v53, 0.0 }
 0x168   : >> { %v496_v23 = vpop.permute.xlu0 %495 }
 0x169   : >> { %v477_v55 = vadd.f32 1e-05, %v472_v54 }
 0x16b   : >> { %884 = vrsqrt.f32 %v477_v55 }
 0x175   : >> { %v885_v56 = vpop.eup %884 }
 0x176   : >> { %v479_v57 = vmul.f32 %v885_v56, %v473_v50  ;;  %v480_v58 = vmul.f32 %v885_v56, %v474_v51  ;;  %v481_v59 = vmul.f32 %v885_v56, %v475_v49  ;;  %v482_v60 = vmul.f32 %v885_v56, %v476_v52 }
 0x178   : >> { %v797_v61 = vpack.c.bf16 %v480_v58, %v479_v57  ;;  %v801_v62 = vpack.c.bf16 %v482_v60, %v481_v59 }
 0x17a   : >> { %798 = vmatprep.subr.bf16.mxu1 %v797_v61 }
 0x17b   : >> { %800 = vmatpush3.bf16.msra.mxu1 %v797_v61 }
 0x17c   : >> { %802 = vmatprep.subr.bf16.mxu1 %v801_v62 }
 0x17f   : >> { %804 = vmatpush3.bf16.msra.mxu1 %v801_v62 }
 0x182   : >> { %784 = vmatmul.mubr.msk.f32.vlgmr.msra.gmra.mrb[0].mxu1 %vm348_vm0, %v1214_v9 }
 0x183   : >> { %786 = vmatprep.mubr.msk.f32.mxu1 %vm348_vm0, %v1219_v10 }
 0x186   : >> { %787 = vmatmul.mubr.msk.f32.gmra.mrb[2].mxu1 %vm348_vm0, %v1224_v11 }
 0x255   : >> { %v785_v17 = vpop.f32.mrb[0].mxu1 }
 0x256   : >> { %v587_v18 = vadd.f32 %v785_v17, %v491_v63  ;;  %v581_v19 = vpop.f32.mrb[1].mxu1 }
 0x257   : >> { %v582_v20 = vadd.f32 %v581_v19, %v486_v16  ;;  %283 = sbr.rel (!%p281_p8) target bundleno = 64 (0x40), region = 94 }
 0x258   : >> { %602 = vst [vmem:[%s600_s10 + $0x8] sm:$0xff] %v587_v18 }
 0x259   : >> { %601 = vst [vmem:[%s600_s10] sm:$0xff] %v582_v20  ;;  %v788_v22 = vpop.f32.mrb[2].mxu1 }
 0x25a   : >> { %v597_v24 = vadd.f32 %v788_v22, %v501_v21  ;;  %v591_v25 = vpop.f32.mrb[3].mxu1 }
 0x25b   : >> { %v592_v26 = vadd.f32 %v591_v25, %v496_v23 }
 0x25c   : >> { %604 = vst [vmem:[%s600_s10 + $0x18] sm:$0xff] %v597_v24 }
 0x25d   : >> { %603 = vst [vmem:[%s600_s10 + $0x10] sm:$0xff] %v592_v26 }
 0x25e   : > { %929 = shalt.err (!%p926_p4)
}
 0x25f   : > { %s930_s30 = scalar_lea.hbm %s1291_s24, 1024  ;;  %s934_s28 = scalar_lea.hbm %s1347_s5, 4096 }
 0x260   : > { %p931_p6 = scmp.ne.s32.totalorder %s1291_s24, %s930_s30  ;;  %p935_p2 = scmp.lt.u32.totalorder %s1291_s24, %s1347_s5 }
 0x261   : > { %p936_p5 = scmp.lt.u32.totalorder %s934_s28, %s930_s30  ;;  %p938_p9 = scmp.lt.u32.totalorder %s930_s30, %s1291_s24 }
 0x262   : > { %p932_p7 = pnand %p931_p6, %p1355_p11 }
 0x263   : > { %p937_p8 = por %p936_p5, %p935_p2 }
 0x264   : > { %p933_p0 = pneg %p932_p7 }
 0x265   : > { %p939_p13 = por %p938_p9, %p937_p8 }
 0x267   : > { %p940_p10 = pnand %p939_p13, %p933_p0 }
 0x269   : > { %943 = shalt.err (!%p940_p10)
}
 0x26a   : > { %s1013_s16 = smov 128   ;;  %s1014_s17 = smov 8  }
 0x26b   : > { %807 = dma.vmem_to_hbm [thread:$0]  (%p1355_p11), %s1294_s9, 1024, %s1291_s24, %s606_s12, %s1013_s16, %s1013_s16, %s1014_s17  }
 0x26c PF: > { %p818_p12 = scmp.ge.s32.totalorder %s1002_s23, 2  ;;  %s636_s13 = sand.u32 1, %s982_s18  }
 0x26d   : > { %p1356_p1 = scmp.ne.s32.totalorder %s1352_s8, 0  ;;  %s637_s11 = scalar_lea.sflag [#allocation4], %s636_s13 }
 0x26f   : > { %p814_p3 = pnand %p818_p12, %p1356_p1 }
 0x271   : > { %977 = dma.done.wait (!%p814_p3), %s637_s11, 1024  }
 0x272   : > { %979 = vsyncadd (!%p814_p3), %s637_s11, 4294966272  ;;  %s21_s23 = sadd.s32 1, %s1002_s23   ;;  %s1357_s18 = smov %s986_s19 }
 0x273   : > { %p18_p4 = scmp.ge.s32.totalorder %s21_s23, 6   ;;  %s1358_s19 = smov %s990_s20 }
 0x274   : > { %s1359_s20 = smov %s1101_s7  ;;  %s1360_s21 = smov %s998_s22 }
 0x275   : > { %s1361_s22 = smov %s1363_s26  ;;  %20 = sbr.rel (!%p18_p4) target bundleno = 6 (0x6), region = 105 }
 0x27c   :  { %642 = vsyncpa [#allocation3], 1 }
 0x27d   :  { %644 = vsyncpa [#allocation3 + $0x1], 1 }
 0x27e   :  { %645 = vsyncpa [#allocation4], 1 }
 0x27f   :  { %647 = vsyncpa [#allocation4 + $0x1], 1 }

</bundles_post_ra>
